<compile_context>
chip_gen: v5e
topology: v5e:2x2
jax: 0.10.0
libtpu: 0.0.40
codegen_flags: <defaults>
</compile_context>

<pallas_src>
import functools

import jax
import jax.numpy as jnp
from jax.experimental import pallas as pl
from jax.experimental.pallas import tpu as pltpu


_MIB = 1024 * 1024
_DEFAULT_VOCAB_CHUNK = 2048          # lanes of f32 temps live per online-softmax step
_F32_TEMP_FACTOR = 6                 # ~live [TN, chunk] f32 temporaries inside one chunk
_STEP_INPUT_BYTE_TARGET = 8 * _MIB   # target logit bytes per grid step


def _round_down(x, m):
    return (x // m) * m


def _round_up(x, m):
    return ((x + m - 1) // m) * m


def _vmem_capacity_bytes():
    """Per-core VMEM capacity, with a device_kind fallback for AOT / mock tracing."""
    try:
        cap = getattr(pltpu.get_tpu_info(), "vmem_capacity_bytes", None)
        if cap:
            return int(cap)
    except Exception:
        pass
    try:
        kind = jax.devices()[0].device_kind.lower()
    except Exception:
        kind = ""
    if "v3" in kind:
        return 16 * _MIB
    if any(t in kind for t in ("v4", "v5", "v6", "trillium")):
        return 128 * _MIB
    if "7" in kind:
        return 64 * _MIB
    return 64 * _MIB                 # conservative default (v7x-sized)


def _distill_partial_kernel(t_ref, s_ref, m_ref, kl_ref, msum_ref, *,
                            inv_temperature, vocab_chunk, rows_total, need_row_mask):
    """Masked-KL partial sums for one tile of tokens.

    t_ref, s_ref : (TN, V)   teacher / student logits, native HBM dtype (bf16/f32)
    m_ref        : (TN, 1)   token mask (f32)
    kl_ref       : (1, 1, 1) sum over tile of kl_per_token * mask
    msum_ref     : (1, 1, 1) sum over tile of mask
    """
    tn, v = t_ref.shape
    inv_t = jnp.float32(inv_temperature)

    # Online softmax over static vocab chunks: only [TN, vocab_chunk] f32 temps are live.
    m_t = t_sum = num = m_s = s_sum = None
    for ci, off in enumerate(range(0, v, vocab_chunk)):
        vc = min(vocab_chunk, v - off)
        t_nat = t_ref[:, off:off + vc]
        s_nat = s_ref[:, off:off + vc]
        # Chunk maxima on the native dtype (bf16 VALU is 2x wide on v6e/v7x); exact because
        # max commutes with the monotone cast and the positive 1/T scale.
        ct_max = jnp.max(t_nat, axis=-1, keepdims=True).astype(jnp.float32) * inv_t
        cs_max = jnp.max(s_nat, axis=-1, keepdims=True).astype(jnp.float32) * inv_t
        t_c = t_nat.astype(jnp.float32) * inv_t
        s_c = s_nat.astype(jnp.float32) * inv_t
        if ci == 0:
            m_t, m_s = ct_max, cs_max
            p = jnp.exp(t_c - m_t)
            t_sum = jnp.sum(p, axis=-1, keepdims=True)
            num = jnp.sum(p * (t_c - s_c), axis=-1, keepdims=True)
            s_sum = jnp.sum(jnp.exp(s_c - m_s), axis=-1, keepdims=True)
        else:
            m_t_new = jnp.maximum(m_t, ct_max)
            alpha = jnp.exp(m_t - m_t_new)
            p = jnp.exp(t_c - m_t_new)
            t_sum = alpha * t_sum + jnp.sum(p, axis=-1, keepdims=True)
            num = alpha * num + jnp.sum(p * (t_c - s_c), axis=-1, keepdims=True)
            m_t = m_t_new

            m_s_new = jnp.maximum(m_s, cs_max)
            beta = jnp.exp(m_s - m_s_new)
            s_sum = beta * s_sum + jnp.sum(jnp.exp(s_c - m_s_new), axis=-1, keepdims=True)
            m_s = m_s_new

    # KL(teacher || student) per token, with scaled logits t' = t/T, s' = s/T:
    #   sum_v softmax(t')*(log_softmax(t') - log_softmax(s'))
    # = num / t_sum + (m_s - m_t) + log(s_sum) - log(t_sum),
    #   where num = sum_v exp(t' - m_t) * (t' - s').
    inv_tsum = pl.reciprocal(t_sum, approx=True)        # EUP slot
    inv_tsum = inv_tsum * (2.0 - t_sum * inv_tsum)      # one Newton step (per-row, cheap)
    kl_tok = num * inv_tsum + (m_s - m_t) + jnp.log(s_sum) - jnp.log(t_sum)   # (TN, 1)

    m = m_ref[...].astype(jnp.float32)                  # (TN, 1)
    if need_row_mask:
        # Ragged last tile: rows past rows_total hold stale VMEM.  Selects (not multiplies)
        # so garbage-row NaN/Inf cannot leak into the sums.
        row_ids = pl.program_id(0) * tn + jax.lax.broadcasted_iota(jnp.int32, (tn, 1), 0)
        valid = row_ids < rows_total
        m = jnp.where(valid, m, 0.0)
        kl_tok = jnp.where(valid, kl_tok, 0.0)

    kl_ref[...] = jnp.sum(kl_tok * m, axis=0, keepdims=True)[None]    # (1,1,1)
    msum_ref[...] = jnp.sum(m, axis=0, keepdims=True)[None]           # (1,1,1)


def distillation_loss(teacher_logits, student_logits, mask, *, temperature=1.0,
                      token_tile=None, vocab_chunk=None):
    """Pallas implementation of DistillationLoss.forward.

    teacher_logits, student_logits: [B, S, V] float (bf16/f32 — kept in native HBM dtype)
    mask:                           [B, S]   float/bool
    Returns a scalar float32 loss.
    """
    B, S, V = teacher_logits.shape
    N = B * S

    t_bytes = jnp.dtype(teacher_logits.dtype).itemsize
    s_bytes = jnp.dtype(student_logits.dtype).itemsize
    pack = max(8, 32 // t_bytes, 32 // s_bytes)          # sublane packing of the inputs

    if vocab_chunk is None:
        vocab_chunk = _DEFAULT_VOCAB_CHUNK
    vocab_chunk = max(128, min(int(vocab_chunk), V)) if V >= 128 else V

    # --- VMEM-consistent token tiling -----------------------------------------------------
    cap = _vmem_capacity_bytes()
    vmem_limit = max(8 * _MIB, min(cap - 4 * _MIB, (cap * 7) // 8))
    budget = max(4 * _MIB, vmem_limit - 4 * _MIB)        # margin for outputs / internal scratch

    # per row: double-buffered native-dtype logit tiles + per-chunk f32 temps + mask/stats
    per_row = V * 2 * (t_bytes + s_bytes) + vocab_chunk * 4 * _F32_TEMP_FACTOR + 64
    vmem_rows = max(pack, budget // per_row)
    target_rows = max(pack, _STEP_INPUT_BYTE_TARGET // max(1, V * (t_bytes + s_bytes)))

    if token_tile is None:
        token_tile = min(vmem_rows, target_rows)
        token_tile = max(pack, _round_down(token_tile, pack))
        token_tile = min(token_tile, _round_up(N, pack))
        grid_n = pl.cdiv(N, token_tile)
        # v7x has 2 TensorCores; the fully "parallel" token grid is sharded across them, so
        # keep grid_n >= 2 (and even when cheap) to avoid leaving a core idle.
        if grid_n == 1 and N > pack:
            cand = _round_up(pl.cdiv(N, 2), pack)
            if pl.cdiv(N, cand) >= 2:
                token_tile, grid_n = cand, pl.cdiv(N, cand)
        elif grid_n >= 3 and grid_n % 2 == 1:
            cand = max(pack, _round_up(pl.cdiv(N, grid_n + 1), pack))
            if pl.cdiv(N, cand) % 2 == 0:
                token_tile, grid_n = cand, pl.cdiv(N, cand)
    else:
        token_tile = max(pack, _round_down(int(token_tile), pack))
        grid_n = pl.cdiv(N, token_tile)

    # --- inputs in native dtype, no padding -------------------------------------------------
    t2 = teacher_logits.reshape(N, V)
    s2 = student_logits.reshape(N, V)
    m2 = mask.reshape(N, 1).astype(jnp.float32)

    kernel = functools.partial(
        _distill_partial_kernel,
        inv_temperature=1.0 / float(temperature),
        vocab_chunk=vocab_chunk,
        rows_total=N,
        need_row_mask=(N % token_tile != 0),
    )

    in_bytes = N * V * (t_bytes + s_bytes) + N * 4
    cost = pl.CostEstimate(flops=10 * N * V,
                           transcendentals=2 * N * V,
                           bytes_accessed=in_bytes + grid_n * 8)

    kl_parts, m_parts = pl.pallas_call(
        kernel,
        out_shape=(jax.ShapeDtypeStruct((grid_n, 1, 1), jnp.float32),
                   jax.ShapeDtypeStruct((grid_n, 1, 1), jnp.float32)),
        grid_spec=pltpu.PrefetchScalarGridSpec(
            num_scalar_prefetch=0,
            grid=(grid_n,),
            in_specs=[
                pl.BlockSpec((token_tile, V), lambda i: (i, 0)),
                pl.BlockSpec((token_tile, V), lambda i: (i, 0)),
                pl.BlockSpec((token_tile, 1), lambda i: (i, 0)),
            ],
            out_specs=[
                pl.BlockSpec((1, 1, 1), lambda i: (i, 0, 0)),
                pl.BlockSpec((1, 1, 1), lambda i: (i, 0, 0)),
            ],
        ),
        compiler_params=pltpu.CompilerParams(
            dimension_semantics=("parallel",),           # independent per-tile partials
            vmem_limit_bytes=int(vmem_limit),
        ),
        cost_estimate=cost,
    )(t2, s2, m2)

    kl_total = jnp.sum(kl_parts)
    mask_total = jnp.sum(m_parts)
    # NOTE: an all-zero mask yields NaN/Inf, matching the reference PyTorch module.
    return kl_total / mask_total * jnp.float32(temperature) ** 2


def _reference_loss(teacher_logits, student_logits, mask, temperature):
    t = teacher_logits.astype(jnp.float32) / temperature
    s = student_logits.astype(jnp.float32) / temperature
    t_prob = jax.nn.softmax(t, axis=-1)
    kl_per_tok = jnp.sum(t_prob * (jax.nn.log_softmax(t, axis=-1)
                                   - jax.nn.log_softmax(s, axis=-1)), axis=-1)
    return (kl_per_tok * mask).sum() / mask.sum() * temperature ** 2


if __name__ == "__main__":
    key = jax.random.PRNGKey(0)
    k1, k2, k3 = jax.random.split(key, 3)

    # N = 18 tokens -> ragged last tile (exercises the in-kernel row-validity path);
    # vocab_chunk=128 with V=384 -> 3 online-softmax chunks.
    B, S, V = 2, 9, 384
    temperature = 2.0

    # bf16 logits: exercises the native-dtype HBM-read path (cast to f32 happens in-kernel).
    teacher_logits = jax.random.normal(k1, (B, S, V), dtype=jnp.float32).astype(jnp.bfloat16)
    student_logits = jax.random.normal(k2, (B, S, V), dtype=jnp.float32).astype(jnp.bfloat16)
    mask = (jax.random.uniform(k3, (B, S)) > 0.3).astype(jnp.float32)

    loss = distillation_loss(teacher_logits, student_logits, mask,
                             temperature=temperature, vocab_chunk=128)
    loss = jax.block_until_ready(loss)

    ref = _reference_loss(teacher_logits, student_logits, mask, temperature)
    assert jnp.allclose(loss, ref, rtol=1e-4, atol=1e-4), (loss, ref)

    print("KERNEL_OK")
</pallas_src>

<mosaic_0001>
module attributes {stable_mosaic.version = 11 : i64} {
  func.func @_distill_partial_kernel(%arg0: i32, %arg1: memref<16x384xbf16, #tpu.memory_space<vmem>>, %arg2: memref<16x384xbf16, #tpu.memory_space<vmem>>, %arg3: memref<16x1xf32, #tpu.memory_space<vmem>>, %arg4: memref<1x1x1xf32, #tpu.memory_space<vmem>>, %arg5: memref<1x1x1xf32, #tpu.memory_space<vmem>>) attributes {dimension_semantics = [#tpu.dimension_semantics<parallel>], iteration_bounds = array<i64: 2>, scalar_prefetch = 0 : i64, scratch_operands = 0 : i64, tpu.core_type = #tpu.core_type<tc>, window_params = [{transform_indices = @transform_0, window_bounds = array<i64: 16, 384>}, {transform_indices = @transform_1, window_bounds = array<i64: 16, 384>}, {transform_indices = @transform_2, window_bounds = array<i64: 16, 1>}, {transform_indices = @transform_3, window_bounds = array<i64: 1, 1, 1>}, {transform_indices = @transform_4, window_bounds = array<i64: 1, 1, 1>}]} {
    %c0 = arith.constant 0 : index
    %c0_0 = arith.constant 0 : index
    %0 = vector.load %arg1[%c0, %c0_0] : memref<16x384xbf16, #tpu.memory_space<vmem>>, vector<16x128xbf16>
    %c0_1 = arith.constant 0 : index
    %c0_2 = arith.constant 0 : index
    %1 = vector.load %arg2[%c0_1, %c0_2] : memref<16x384xbf16, #tpu.memory_space<vmem>>, vector<16x128xbf16>
    %cst = arith.constant dense<0xFF80> : vector<16xbf16>
    %2 = vector.multi_reduction <maximumf>, %0, %cst [1] : vector<16x128xbf16> to vector<16xbf16>
    %3 = vector.shape_cast %2 : vector<16xbf16> to vector<16x1xbf16>
    %4 = arith.extf %3 : vector<16x1xbf16> to vector<16x1xf32>
    %cst_3 = arith.constant 5.000000e-01 : f32
    %5 = vector.broadcast %cst_3 : f32 to vector<16x1xf32>
    %6 = arith.mulf %4, %5 : vector<16x1xf32>
    %cst_4 = arith.constant dense<0xFF80> : vector<16xbf16>
    %7 = vector.multi_reduction <maximumf>, %1, %cst_4 [1] : vector<16x128xbf16> to vector<16xbf16>
    %8 = vector.shape_cast %7 : vector<16xbf16> to vector<16x1xbf16>
    %9 = arith.extf %8 : vector<16x1xbf16> to vector<16x1xf32>
    %cst_5 = arith.constant 5.000000e-01 : f32
    %10 = vector.broadcast %cst_5 : f32 to vector<16x1xf32>
    %11 = arith.mulf %9, %10 : vector<16x1xf32>
    %12 = arith.extf %0 : vector<16x128xbf16> to vector<16x128xf32>
    %cst_6 = arith.constant 5.000000e-01 : f32
    %13 = vector.broadcast %cst_6 : f32 to vector<16x128xf32>
    %14 = arith.mulf %12, %13 : vector<16x128xf32>
    %15 = arith.extf %1 : vector<16x128xbf16> to vector<16x128xf32>
    %cst_7 = arith.constant 5.000000e-01 : f32
    %16 = vector.broadcast %cst_7 : f32 to vector<16x128xf32>
    %17 = arith.mulf %15, %16 : vector<16x128xf32>
    %18 = vector.broadcast %6 : vector<16x1xf32> to vector<16x128xf32>
    %19 = arith.subf %14, %18 : vector<16x128xf32>
    %20 = math.exp %19 : vector<16x128xf32>
    %cst_8 = arith.constant dense<0.000000e+00> : vector<16xf32>
    %21 = vector.multi_reduction <add>, %20, %cst_8 [1] : vector<16x128xf32> to vector<16xf32>
    %22 = vector.shape_cast %21 : vector<16xf32> to vector<16x1xf32>
    %23 = arith.subf %14, %17 : vector<16x128xf32>
    %24 = arith.mulf %20, %23 : vector<16x128xf32>
    %cst_9 = arith.constant dense<0.000000e+00> : vector<16xf32>
    %25 = vector.multi_reduction <add>, %24, %cst_9 [1] : vector<16x128xf32> to vector<16xf32>
    %26 = vector.shape_cast %25 : vector<16xf32> to vector<16x1xf32>
    %27 = vector.broadcast %11 : vector<16x1xf32> to vector<16x128xf32>
    %28 = arith.subf %17, %27 : vector<16x128xf32>
    %29 = math.exp %28 : vector<16x128xf32>
    %cst_10 = arith.constant dense<0.000000e+00> : vector<16xf32>
    %30 = vector.multi_reduction <add>, %29, %cst_10 [1] : vector<16x128xf32> to vector<16xf32>
    %31 = vector.shape_cast %30 : vector<16xf32> to vector<16x1xf32>
    %c0_11 = arith.constant 0 : index
    %c128 = arith.constant 128 : index
    %32 = vector.load %arg1[%c0_11, %c128] : memref<16x384xbf16, #tpu.memory_space<vmem>>, vector<16x128xbf16>
    %c0_12 = arith.constant 0 : index
    %c128_13 = arith.constant 128 : index
    %33 = vector.load %arg2[%c0_12, %c128_13] : memref<16x384xbf16, #tpu.memory_space<vmem>>, vector<16x128xbf16>
    %cst_14 = arith.constant dense<0xFF80> : vector<16xbf16>
    %34 = vector.multi_reduction <maximumf>, %32, %cst_14 [1] : vector<16x128xbf16> to vector<16xbf16>
    %35 = vector.shape_cast %34 : vector<16xbf16> to vector<16x1xbf16>
    %36 = arith.extf %35 : vector<16x1xbf16> to vector<16x1xf32>
    %cst_15 = arith.constant 5.000000e-01 : f32
    %37 = vector.broadcast %cst_15 : f32 to vector<16x1xf32>
    %38 = arith.mulf %36, %37 : vector<16x1xf32>
    %cst_16 = arith.constant dense<0xFF80> : vector<16xbf16>
    %39 = vector.multi_reduction <maximumf>, %33, %cst_16 [1] : vector<16x128xbf16> to vector<16xbf16>
    %40 = vector.shape_cast %39 : vector<16xbf16> to vector<16x1xbf16>
    %41 = arith.extf %40 : vector<16x1xbf16> to vector<16x1xf32>
    %cst_17 = arith.constant 5.000000e-01 : f32
    %42 = vector.broadcast %cst_17 : f32 to vector<16x1xf32>
    %43 = arith.mulf %41, %42 : vector<16x1xf32>
    %44 = arith.extf %32 : vector<16x128xbf16> to vector<16x128xf32>
    %cst_18 = arith.constant 5.000000e-01 : f32
    %45 = vector.broadcast %cst_18 : f32 to vector<16x128xf32>
    %46 = arith.mulf %44, %45 : vector<16x128xf32>
    %47 = arith.extf %33 : vector<16x128xbf16> to vector<16x128xf32>
    %cst_19 = arith.constant 5.000000e-01 : f32
    %48 = vector.broadcast %cst_19 : f32 to vector<16x128xf32>
    %49 = arith.mulf %47, %48 : vector<16x128xf32>
    %50 = arith.maximumf %6, %38 : vector<16x1xf32>
    %51 = arith.subf %6, %50 : vector<16x1xf32>
    %52 = math.exp %51 : vector<16x1xf32>
    %53 = vector.broadcast %50 : vector<16x1xf32> to vector<16x128xf32>
    %54 = arith.subf %46, %53 : vector<16x128xf32>
    %55 = math.exp %54 : vector<16x128xf32>
    %56 = arith.mulf %52, %22 : vector<16x1xf32>
    %cst_20 = arith.constant dense<0.000000e+00> : vector<16xf32>
    %57 = vector.multi_reduction <add>, %55, %cst_20 [1] : vector<16x128xf32> to vector<16xf32>
    %58 = vector.shape_cast %57 : vector<16xf32> to vector<16x1xf32>
    %59 = arith.addf %56, %58 : vector<16x1xf32>
    %60 = arith.mulf %52, %26 : vector<16x1xf32>
    %61 = arith.subf %46, %49 : vector<16x128xf32>
    %62 = arith.mulf %55, %61 : vector<16x128xf32>
    %cst_21 = arith.constant dense<0.000000e+00> : vector<16xf32>
    %63 = vector.multi_reduction <add>, %62, %cst_21 [1] : vector<16x128xf32> to vector<16xf32>
    %64 = vector.shape_cast %63 : vector<16xf32> to vector<16x1xf32>
    %65 = arith.addf %60, %64 : vector<16x1xf32>
    %66 = arith.maximumf %11, %43 : vector<16x1xf32>
    %67 = arith.subf %11, %66 : vector<16x1xf32>
    %68 = math.exp %67 : vector<16x1xf32>
    %69 = arith.mulf %68, %31 : vector<16x1xf32>
    %70 = vector.broadcast %66 : vector<16x1xf32> to vector<16x128xf32>
    %71 = arith.subf %49, %70 : vector<16x128xf32>
    %72 = math.exp %71 : vector<16x128xf32>
    %cst_22 = arith.constant dense<0.000000e+00> : vector<16xf32>
    %73 = vector.multi_reduction <add>, %72, %cst_22 [1] : vector<16x128xf32> to vector<16xf32>
    %74 = vector.shape_cast %73 : vector<16xf32> to vector<16x1xf32>
    %75 = arith.addf %69, %74 : vector<16x1xf32>
    %c0_23 = arith.constant 0 : index
    %c256 = arith.constant 256 : index
    %76 = vector.load %arg1[%c0_23, %c256] : memref<16x384xbf16, #tpu.memory_space<vmem>>, vector<16x128xbf16>
    %c0_24 = arith.constant 0 : index
    %c256_25 = arith.constant 256 : index
    %77 = vector.load %arg2[%c0_24, %c256_25] : memref<16x384xbf16, #tpu.memory_space<vmem>>, vector<16x128xbf16>
    %cst_26 = arith.constant dense<0xFF80> : vector<16xbf16>
    %78 = vector.multi_reduction <maximumf>, %76, %cst_26 [1] : vector<16x128xbf16> to vector<16xbf16>
    %79 = vector.shape_cast %78 : vector<16xbf16> to vector<16x1xbf16>
    %80 = arith.extf %79 : vector<16x1xbf16> to vector<16x1xf32>
    %cst_27 = arith.constant 5.000000e-01 : f32
    %81 = vector.broadcast %cst_27 : f32 to vector<16x1xf32>
    %82 = arith.mulf %80, %81 : vector<16x1xf32>
    %cst_28 = arith.constant dense<0xFF80> : vector<16xbf16>
    %83 = vector.multi_reduction <maximumf>, %77, %cst_28 [1] : vector<16x128xbf16> to vector<16xbf16>
    %84 = vector.shape_cast %83 : vector<16xbf16> to vector<16x1xbf16>
    %85 = arith.extf %84 : vector<16x1xbf16> to vector<16x1xf32>
    %cst_29 = arith.constant 5.000000e-01 : f32
    %86 = vector.broadcast %cst_29 : f32 to vector<16x1xf32>
    %87 = arith.mulf %85, %86 : vector<16x1xf32>
    %88 = arith.extf %76 : vector<16x128xbf16> to vector<16x128xf32>
    %cst_30 = arith.constant 5.000000e-01 : f32
    %89 = vector.broadcast %cst_30 : f32 to vector<16x128xf32>
    %90 = arith.mulf %88, %89 : vector<16x128xf32>
    %91 = arith.extf %77 : vector<16x128xbf16> to vector<16x128xf32>
    %cst_31 = arith.constant 5.000000e-01 : f32
    %92 = vector.broadcast %cst_31 : f32 to vector<16x128xf32>
    %93 = arith.mulf %91, %92 : vector<16x128xf32>
    %94 = arith.maximumf %50, %82 : vector<16x1xf32>
    %95 = arith.subf %50, %94 : vector<16x1xf32>
    %96 = math.exp %95 : vector<16x1xf32>
    %97 = vector.broadcast %94 : vector<16x1xf32> to vector<16x128xf32>
    %98 = arith.subf %90, %97 : vector<16x128xf32>
    %99 = math.exp %98 : vector<16x128xf32>
    %100 = arith.mulf %96, %59 : vector<16x1xf32>
    %cst_32 = arith.constant dense<0.000000e+00> : vector<16xf32>
    %101 = vector.multi_reduction <add>, %99, %cst_32 [1] : vector<16x128xf32> to vector<16xf32>
    %102 = vector.shape_cast %101 : vector<16xf32> to vector<16x1xf32>
    %103 = arith.addf %100, %102 : vector<16x1xf32>
    %104 = arith.mulf %96, %65 : vector<16x1xf32>
    %105 = arith.subf %90, %93 : vector<16x128xf32>
    %106 = arith.mulf %99, %105 : vector<16x128xf32>
    %cst_33 = arith.constant dense<0.000000e+00> : vector<16xf32>
    %107 = vector.multi_reduction <add>, %106, %cst_33 [1] : vector<16x128xf32> to vector<16xf32>
    %108 = vector.shape_cast %107 : vector<16xf32> to vector<16x1xf32>
    %109 = arith.addf %104, %108 : vector<16x1xf32>
    %110 = arith.maximumf %66, %87 : vector<16x1xf32>
    %111 = arith.subf %66, %110 : vector<16x1xf32>
    %112 = math.exp %111 : vector<16x1xf32>
    %113 = arith.mulf %112, %75 : vector<16x1xf32>
    %114 = vector.broadcast %110 : vector<16x1xf32> to vector<16x128xf32>
    %115 = arith.subf %93, %114 : vector<16x128xf32>
    %116 = math.exp %115 : vector<16x128xf32>
    %cst_34 = arith.constant dense<0.000000e+00> : vector<16xf32>
    %117 = vector.multi_reduction <add>, %116, %cst_34 [1] : vector<16x128xf32> to vector<16xf32>
    %118 = vector.shape_cast %117 : vector<16xf32> to vector<16x1xf32>
    %119 = arith.addf %113, %118 : vector<16x1xf32>
    %120 = tpu.reciprocal %103 {approx = true} : vector<16x1xf32> -> vector<16x1xf32>
    %121 = arith.mulf %103, %120 : vector<16x1xf32>
    %cst_35 = arith.constant 2.000000e+00 : f32
    %122 = vector.broadcast %cst_35 : f32 to vector<16x1xf32>
    %123 = arith.subf %122, %121 : vector<16x1xf32>
    %124 = arith.mulf %120, %123 : vector<16x1xf32>
    %125 = arith.mulf %109, %124 : vector<16x1xf32>
    %126 = arith.subf %110, %94 : vector<16x1xf32>
    %127 = arith.addf %125, %126 : vector<16x1xf32>
    %128 = math.log %119 : vector<16x1xf32>
    %129 = arith.addf %127, %128 : vector<16x1xf32>
    %130 = math.log %103 : vector<16x1xf32>
    %131 = arith.subf %129, %130 : vector<16x1xf32>
    %c0_36 = arith.constant 0 : index
    %c0_37 = arith.constant 0 : index
    %132 = vector.load %arg3[%c0_36, %c0_37] : memref<16x1xf32, #tpu.memory_space<vmem>>, vector<16x1xf32>
    %c16_i32 = arith.constant 16 : i32
    %133 = arith.muli %arg0, %c16_i32 : i32
    %134 = tpu.iota {dimensions = array<i32: 0>} : vector<16x1xi32>
    %135 = vector.broadcast %133 : i32 to vector<16x1xi32>
    %136 = arith.addi %135, %134 : vector<16x1xi32>
    %c18_i32 = arith.constant 18 : i32
    %137 = vector.broadcast %c18_i32 : i32 to vector<16x1xi32>
    %138 = arith.cmpi slt, %136, %137 : vector<16x1xi32>
    %cst_38 = arith.constant 0.000000e+00 : f32
    %139 = vector.broadcast %cst_38 : f32 to vector<16x1xf32>
    %140 = arith.select %138, %132, %139 : vector<16x1xi1>, vector<16x1xf32>
    %cst_39 = arith.constant 0.000000e+00 : f32
    %141 = vector.broadcast %cst_39 : f32 to vector<16x1xf32>
    %142 = arith.select %138, %131, %141 : vector<16x1xi1>, vector<16x1xf32>
    %143 = arith.mulf %142, %140 : vector<16x1xf32>
    %cst_40 = arith.constant dense<0.000000e+00> : vector<1xf32>
    %144 = vector.multi_reduction <add>, %143, %cst_40 [0] : vector<16x1xf32> to vector<1xf32>
    %145 = vector.shape_cast %144 : vector<1xf32> to vector<1x1xf32>
    %146 = vector.shape_cast %145 : vector<1x1xf32> to vector<1x1x1xf32>
    %c0_41 = arith.constant 0 : index
    %c0_42 = arith.constant 0 : index
    %c0_43 = arith.constant 0 : index
    %147 = vector.load %arg4[%c0_41, %c0_42, %c0_43] : memref<1x1x1xf32, #tpu.memory_space<vmem>>, vector<1x1x1xf32>
    tpu.vector_store %arg4[%c0_41, %c0_42, %c0_43], %146 {strides = array<i32>} : memref<1x1x1xf32, #tpu.memory_space<vmem>>, vector<1x1x1xf32>,
    %cst_44 = arith.constant dense<0.000000e+00> : vector<1xf32>
    %148 = vector.multi_reduction <add>, %140, %cst_44 [0] : vector<16x1xf32> to vector<1xf32>
    %149 = vector.shape_cast %148 : vector<1xf32> to vector<1x1xf32>
    %150 = vector.shape_cast %149 : vector<1x1xf32> to vector<1x1x1xf32>
    %c0_45 = arith.constant 0 : index
    %c0_46 = arith.constant 0 : index
    %c0_47 = arith.constant 0 : index
    %151 = vector.load %arg5[%c0_45, %c0_46, %c0_47] : memref<1x1x1xf32, #tpu.memory_space<vmem>>, vector<1x1x1xf32>
    tpu.vector_store %arg5[%c0_45, %c0_46, %c0_47], %150 {strides = array<i32>} : memref<1x1x1xf32, #tpu.memory_space<vmem>>, vector<1x1x1xf32>,
    return
  }
  func.func @transform_0(%arg0: i32) -> (i32, i32) {
    %c0_i32 = arith.constant 0 : i32
    %c0_i32_0 = arith.constant 0 : i32
    return %arg0, %c0_i32 : i32, i32
  }
  func.func @transform_1(%arg0: i32) -> (i32, i32) {
    %c0_i32 = arith.constant 0 : i32
    %c0_i32_0 = arith.constant 0 : i32
    return %arg0, %c0_i32 : i32, i32
  }
  func.func @transform_2(%arg0: i32) -> (i32, i32) {
    %c0_i32 = arith.constant 0 : i32
    %c0_i32_0 = arith.constant 0 : i32
    return %arg0, %c0_i32 : i32, i32
  }
  func.func @transform_3(%arg0: i32) -> (i32, i32, i32) {
    %c0_i32 = arith.constant 0 : i32
    %c0_i32_0 = arith.constant 0 : i32
    %c0_i32_1 = arith.constant 0 : i32
    return %arg0, %c0_i32, %c0_i32_0 : i32, i32, i32
  }
  func.func @transform_4(%arg0: i32) -> (i32, i32, i32) {
    %c0_i32 = arith.constant 0 : i32
    %c0_i32_0 = arith.constant 0 : i32
    %c0_i32_1 = arith.constant 0 : i32
    return %arg0, %c0_i32, %c0_i32_0 : i32, i32, i32
  }
}

</mosaic_0001>

<bundles_post_ra>
// kernel: tpu_custom_call.1
= control target key start
LH: loop header
LB: loop body
LE: loop exit
PB: predicated region body
PF: predicated region fallthrough
CT: control target
= control target key end

     0   :  { %10 = vsyncpa [#allocation3], 0  ;;  %s1399_s0 = inlined_call_operand.hbm [shape: bf16[18,384], index: 0, kind: input, shape index: {}]   ;;  %s1400_s1 = inlined_call_operand.hbm [shape: bf16[18,384], index: 1, kind: input, shape index: {}]   ;;  %s1401_s2 = inlined_call_operand.vmem [shape: f32[18,1], index: 2, kind: input, shape index: {}]   ;;  %s1402_s3 = inlined_call_operand.vmem [shape: f32[2,1,1], index: 3, kind: output, shape index: {0}]   ;;  %s1403_s4 = inlined_call_operand.vmem [shape: f32[2,1,1], index: 4, kind: output, shape index: {1}]  }
   0x1   :  { %12 = vsyncpa [#allocation3 + $0x1], 0 }
   0x2   :  { %13 = vsyncpa [#allocation5], 0 }
   0x3   :  { %15 = vsyncpa [#allocation5 + $0x1], 0  ;;  %s1026_s15 = smov 0   ;;  %s1028_s16 = smov 0  }
   0x4   :  { %s1030_s17 = smov 0   ;;  %s1032_s18 = smov 0  }
   0x5 LB: > { %s1045_s19 = sadd.s32 4294967295, %s993_s18   ;;  %s1048_s20 = sadd.s32 1, %s993_s18   ;;  %s993_s18 = sphi %s1032_s18, %s1411_s18   ;;  %s989_s17 = sphi %s1030_s17, %s1410_s17   ;;  %s985_s16 = sphi %s1028_s16, %s1409_s16   ;;  %s981_s15 = sphi %s1026_s15, %s1408_s15  }
   0x6   : > { %s25_s21 = ssub.s32 %s993_s18, %s1048_s20  ;;  %s28_s22 = sadd.s32 1, %s989_s17 }
   0x7   : > { %p26_p0 = scmp.eq.s32.totalorder %s25_s21, 0  ;;  %p35_p1 = scmp.ne.s32.totalorder %s989_s17, %s985_s16 }
   0x8   : > { %p36_p2 = scmp.eq.s32.totalorder %s993_s18, 0  ;;  %p41_p3 = scmp.ne.s32.totalorder %s985_s16, %s981_s15 }
   0x9   : > { %s1058_s23 = scalar_select %p26_p0, %s989_s17, %s28_s22  }
   0xa   : > { %p1060_p4 = por %p36_p2, %p35_p1  ;;  %p42_p5 = scmp.eq.s32.totalorder %s1045_s19, 0 }
   0xb   : > { %p761_p7 = scmp.ge.s32.totalorder %s993_s18, 2 }
   0xc   : > { %p1065_p6 = por %p42_p5, %p41_p3 }
   0xd   : > { %165 = sbr.rel (%p761_p7) target bundleno = 100 (0x64), region = 16 }
  0x12   : > { %168 = sbr.rel (!%p1060_p4) target bundleno = 59 (0x3b), region = 20  ;;  %s169_s26 = sand.u32 (%p1060_p4), 1, %s989_s17  }
  0x13   : > { %s762_s27 = sshll.u32 (%p1060_p4), %s993_s18, 1  ;;  %s782_s28 = smul.u32 (%p1060_p4), 24, %s169_s26 }
  0x14   : > { %s175_s29 = ssub.s32 (%p1060_p4), 3, %s762_s27  ;;  %s1074_s7 = scalar_lea.sflag (%p1060_p4), [#allocation3], %s169_s26 }
  0x15   : > { %p176_p8 = scmp.lt.s32.totalorder (%p1060_p4), %s175_s29, 2  ;;  %s173_s8 = scalar_lea.vmem (%p1060_p4), [#allocation2], %s782_s28 }
  0x17   : > { %s1413_s29 = smov (!%p176_p8, %s175_s29), 2 }
  0x18   : > { %s764_s30 = smul.u32 12, %s1413_s29 }
  0x1a   : > { %s180_s5 = ssub.s32 24, %s764_s30 }
  0x1b   : > { %s181_s6 = sshll.u32 %s180_s5, 4 }
  0x1c   : > { %182 = vsyncadd %s1074_s7, %s181_s6  ;;  %p1077_p9 = scmp.ne.s32.totalorder %s764_s30, 0  ;;  %s783_s10 = smul.u32 24, %s993_s18 }
  0x1d   : > { %s1082_s11 = sshll.u32 %s173_s8, 4  ;;  %s1084_s12 = smul.u32 192, %s1413_s29  ;;  %s191_s11 = int_to_ptr.vmem [resolvable:$true] %s1082_s11 }
  0x1e   : > { %s186_s15 = scalar_lea.hbm %s1399_s0, %s783_s10  ;;  %s888_s6 = scalar_lea.hbm %s1399_s0, 36 }
  0x1f   : > { %s188_s21 = sshll.u32 %s186_s15, 4  ;;  %s879_s26 = sshrl.u32 %s1084_s12, 4  ;;  %s1090_s21 = int_to_ptr.hbm [resolvable:$true] %s188_s21 }
  0x20   : > { %s877_s22 = sshra.s32 %s1090_s21, 4  ;;  %s915_s27 = sshll.u32 %s879_s26, 4  ;;  %s878_s22 = int_to_ptr.hbm [resolvable:$true] %s877_s22 }
  0x21   : > { %p881_p10 = scmp.ne.s32.totalorder %s915_s27, %s1084_s12  ;;  %s882_s28 = sadd.s32 1, %s879_s26 }
  0x22   : > { %p889_p0 = scmp.lt.s32.totalorder %s878_s22, %s1399_s0 }
  0x23   : > { %s1415_s28 = smov (!%p881_p10, %s882_s28), %s879_s26 }
  0x24   : > { %s884_s29 = scalar_lea.hbm %s878_s22, %s1415_s28 }
  0x25   : > { %p885_p11 = scmp.ne.s32.totalorder %s878_s22, %s884_s29  ;;  %p890_p1 = scmp.lt.s32.totalorder %s888_s6, %s884_s29 }
  0x27   : > { %p886_p12 = pnand %p885_p11, %p1077_p9  ;;  %p891_p2 = por %p890_p1, %p889_p0 }
  0x29   : > { %p887_p13 = pneg %p886_p12 }
  0x2b   : > { %p892_p3 = pnand %p891_p2, %p887_p13 }
  0x2d   : > { %895 = shalt.err (!%p892_p3)
}
  0x2e   : > { %s896_s13 = sshra.s32 %s191_s11, 4  ;;  %s995_s15 = smov [#allocation2]   ;;  %s897_s13 = int_to_ptr.vmem [resolvable:$true] %s896_s13 }
  0x2f   : > { %s903_s14 = scalar_lea.vmem %s897_s13, %s1415_s28  ;;  %s907_s26 = scalar_lea.vmem %s995_s15, 48 }
  0x30   : > { %p904_p5 = scmp.ne.s32.totalorder %s897_s13, %s903_s14  ;;  %p909_p10 = scmp.lt.s32.totalorder %s907_s26, %s903_s14 }
  0x32   : > { %p905_p7 = pnand %p904_p5, %p1077_p9 }
  0x34   : > { %p906_p8 = pneg %p905_p7 }
  0x36   : > { %p911_p11 = pnand %p909_p10, %p906_p8 }
  0x38   : > { %914 = shalt.err (!%p911_p11)
}
  0x39   : > { %s996_s22 = smov 192   ;;  %s997_s27 = smov 12  }
  0x3a   : > { %196 = dma.hbm_to_vmem [thread:$0]  (%p1077_p9), %s1090_s21, %s1084_s12, %s191_s11, %s1074_s7, %s996_s22, %s996_s22, %s997_s27  }
  0x3b PF: > { %199 = sbr.rel (!%p1060_p4) target bundleno = 100 (0x64), region = 24  ;;  %s200_s28 = sand.u32 (%p1060_p4), 1, %s989_s17  }
  0x3c   : > { %s769_s29 = sshll.u32 (%p1060_p4), %s993_s18, 1  ;;  %s784_s30 = smul.u32 (%p1060_p4), 24, %s200_s28 }
  0x3d   : > { %s206_s5 = ssub.s32 (%p1060_p4), 3, %s769_s29  ;;  %s1118_s13 = scalar_lea.sflag (%p1060_p4), [#allocation5], %s200_s28 }
  0x3e   : > { %p207_p12 = scmp.lt.s32.totalorder (%p1060_p4), %s206_s5, 2  ;;  %s204_s9 = scalar_lea.vmem (%p1060_p4), [#allocation4], %s784_s30 }
  0x40   : > { %s1417_s5 = smov (!%p207_p12, %s206_s5), 2 }
  0x41   : > { %s771_s6 = smul.u32 12, %s1417_s5 }
  0x43   : > { %s211_s8 = ssub.s32 24, %s771_s6 }
  0x44   : > { %s212_s10 = sshll.u32 %s211_s8, 4 }
  0x45   : > { %213 = vsyncadd %s1118_s13, %s212_s10  ;;  %p1121_p9 = scmp.ne.s32.totalorder %s771_s6, 0  ;;  %s785_s7 = smul.u32 24, %s993_s18 }
  0x46   : > { %s1126_s11 = sshll.u32 %s204_s9, 4  ;;  %s1128_s12 = smul.u32 192, %s1417_s5  ;;  %s222_s11 = int_to_ptr.vmem [resolvable:$true] %s1126_s11 }
  0x47   : > { %s217_s15 = scalar_lea.hbm %s1400_s1, %s785_s7  ;;  %s927_s8 = scalar_lea.hbm %s1400_s1, 36 }
  0x48   : > { %s219_s26 = sshll.u32 %s217_s15, 4  ;;  %s918_s27 = sshrl.u32 %s1128_s12, 4  ;;  %s1134_s26 = int_to_ptr.hbm [resolvable:$true] %s219_s26 }
  0x49   : > { %s916_s22 = sshra.s32 %s1134_s26, 4  ;;  %s954_s28 = sshll.u32 %s918_s27, 4  ;;  %s917_s22 = int_to_ptr.hbm [resolvable:$true] %s916_s22 }
  0x4a   : > { %p920_p4 = scmp.ne.s32.totalorder %s954_s28, %s1128_s12  ;;  %s921_s29 = sadd.s32 1, %s918_s27 }
  0x4b   : > { %p928_p2 = scmp.lt.s32.totalorder %s917_s22, %s1400_s1 }
  0x4c   : > { %s1419_s29 = smov (!%p920_p4, %s921_s29), %s918_s27 }
  0x4d   : > { %s923_s30 = scalar_lea.hbm %s917_s22, %s1419_s29 }
  0x4e   : > { %p924_p13 = scmp.ne.s32.totalorder %s917_s22, %s923_s30  ;;  %p929_p3 = scmp.lt.s32.totalorder %s927_s8, %s923_s30 }
  0x50   : > { %p925_p0 = pnand %p924_p13, %p1121_p9  ;;  %p930_p5 = por %p929_p3, %p928_p2 }
  0x52   : > { %p926_p1 = pneg %p925_p0 }
  0x54   : > { %p931_p7 = pnand %p930_p5, %p926_p1 }
  0x56   : > { %934 = shalt.err (!%p931_p7)
}
  0x57   : > { %s935_s7 = sshra.s32 %s222_s11, 4  ;;  %s998_s14 = smov [#allocation4]   ;;  %s936_s7 = int_to_ptr.vmem [resolvable:$true] %s935_s7 }
  0x58   : > { %s942_s21 = scalar_lea.vmem %s936_s7, %s1419_s29  ;;  %s946_s15 = scalar_lea.vmem %s998_s14, 48 }
  0x59   : > { %p943_p8 = scmp.ne.s32.totalorder %s936_s7, %s942_s21  ;;  %p948_p12 = scmp.lt.s32.totalorder %s946_s15, %s942_s21 }
  0x5b   : > { %p944_p10 = pnand %p943_p8, %p1121_p9 }
  0x5d   : > { %p945_p11 = pneg %p944_p10 }
  0x5f   : > { %p950_p4 = pnand %p948_p12, %p945_p11 }
  0x61   : > { %953 = shalt.err (!%p950_p4)
}
  0x62   : > { %s999_s22 = smov 192   ;;  %s1000_s27 = smov 12  }
  0x63   : > { %227 = dma.hbm_to_vmem [thread:$0]  (%p1121_p9), %s1134_s26, %s1128_s12, %s222_s11, %s1118_s13, %s999_s22, %s999_s22, %s1000_s27  }
  0x64 PF: > { %p776_p13 = scmp.ge.s32.totalorder %s993_s18, 1  ;;  %p246_p0 = scmp.lt.s32.totalorder %s993_s18, 3 }
  0x66   : > { %p247_p1 = pnand %p776_p13, %p246_p0 }
  0x67   : > { %s252_s28 = sand.u32 (!%p247_p1), 1, %s985_s16  }
  0x68   : > { %250 = sbr.rel (%p247_p1) target bundleno = 446 (0x1be), region = 32  ;;  %s253_s30 = scalar_lea.sflag (!%p247_p1), [#allocation3], %s252_s28 }
  0x69   : > { %s786_s29 = smul.u32 (!%p247_p1), 24, %s252_s28 }
  0x6b   : > { %s256_s5 = scalar_lea.vmem (!%p247_p1), [#allocation2], %s786_s29 }
  0x6d   : > { %972 = dma.done.wait (%p1065_p6), %s253_s30, 384  }
  0x6e   : > { %974 = vsyncadd (%p1065_p6), %s253_s30, 4294966912  ;;  %s263_s13 = scalar_lea.sflag [#allocation5], %s252_s28  ;;  %s266_s24 = scalar_lea.vmem [#allocation4], %s786_s29 }
  0x6f   : > { %976 = dma.done.wait (%p1065_p6), %s263_s13, 384  }
  0x70   : > { %978 = vsyncadd (%p1065_p6), %s263_s13, 4294966912  ;;  %v487_v0 = vld [vmem:[%s256_s5 + $0x8] sm:$0xff]   ;;  %v399_v1 = vld [vmem:[%s256_s5] sm:$0xff]   ;;  %s777_s18 = sshll.u32 %s1045_s19, 1  ;;  %s779_s25 = sshll.u32 %s1045_s19, 4  ;;  %vm618_vm1 = vcmask 7168  }
  0x71   : > { %v491_v2 = vunpack.c.l.bf16 %v487_v0  ;;  %v403_v3 = vunpack.c.h.bf16 %v399_v1  ;;  %v343_v4 = vunpack.c.l.bf16 %v399_v1  ;;  %v488_v5 = vld [vmem:[%s256_s5 + $0x10] sm:$0xff]   ;;  %v344_v8 = vunpack.c.h.bf16 %v487_v0  ;;  %v342_v10 = vld [vmem:[%s266_s24 + $0xc] sm:$0xff]   ;;  %v490_v15 = vld [vmem:[%s266_s24 + $0x14] sm:$0xf]  ;;  %p324_p6 = scmp.lt.s32.totalorder %s777_s18, 2  ;;  %p333_p9 = scmp.lt.s32.totalorder %s1045_s19, 1 }
  0x72   : > { %v492_v6 = vunpack.c.h.bf16 %v488_v5  ;;  %v404_v7 = vunpack.c.l.bf16 %v488_v5  ;;  %v401_v9 = vld [vmem:[%s266_s24 + $0x4] sm:$0xff]   ;;  %v341_v11 = vld [vmem:[%s266_s24] sm:$0xf]  ;;  %v356_v13 = vunpack.c.l.bf16 %v342_v10  ;;  %v504_v17 = vunpack.c.l.bf16 %v490_v15 }
  0x73   : > { %493 = vmax.xlane.f32.xlu2 %v491_v2  ;;  %405 = vmax.xlane.f32.xlu1 %v403_v3  ;;  %v415_v12 = vunpack.c.l.bf16 %v401_v9  ;;  %v355_v14 = vunpack.c.l.bf16 %v341_v11  ;;  %v503_v16 = vunpack.c.h.bf16 %v401_v9  ;;  %v416_v18 = vunpack.c.h.bf16 %v342_v10  ;;  %s1421_s18 = smov (!%p324_p6, %s777_s18), 2  ;;  %s1423_s19 = smov (!%p333_p9, %s1045_s19), 1 }
  0x74   : > { %345 = vmax.xlane.f32.xlu0 %v343_v4  ;;  %v1171_v20 = vmul.f32 0.5, %v343_v4  ;;  %v1175_v22 = vmul.f32 0.5, %v403_v3  ;;  %v1181_v25 = vmul.f32 0.5, %v491_v2  ;;  %v1185_v27 = vmul.f32 0.5, %v356_v13  ;;  %s778_s11 = sshll.u32 %s1421_s18, 3  ;;  %s338_s9 = scalar_lea.vmem %s1403_s4, %s1423_s19 }
  0x75   : > { %v1169_v19 = vmul.f32 0.5, %v355_v14  ;;  %v1173_v21 = vmul.f32 0.5, %v415_v12  ;;  %v1177_v23 = vmul.f32 0.5, %v503_v16  ;;  %v1189_v29 = vmul.f32 0.5, %v344_v8  ;;  %s327_s6 = scalar_lea.vmem %s1401_s2, %s778_s11  ;;  %s335_s14 = scalar_lea.vmem %s1402_s3, %s1423_s19 }
  0x76   : > { %v1191_v30 = vmul.f32 0.5, %v416_v18  ;;  %v1193_v31 = vmul.f32 0.5, %v404_v7  ;;  %v1195_v32 = vmul.f32 0.5, %v504_v17  ;;  %v1199_v34 = vmul.f32 0.5, %v492_v6 }
  0x77   : > { %v381_v24 = vsub.f32 %v1171_v20, %v1169_v19  ;;  %v455_v26 = vsub.f32 %v1175_v22, %v1173_v21  ;;  %v543_v28 = vsub.f32 %v1181_v25, %v1177_v23  ;;  %v382_v33 = vsub.f32 %v1189_v29, %v1185_v27 }
  0x78   : > { %v456_v35 = vsub.f32 %v1193_v31, %v1191_v30  ;;  %v544_v36 = vsub.f32 %v1199_v34, %v1195_v32  ;;  %vm628_vm3 = vcmask 0  }
  0x7b   : > { %495 = vmax.xlane.f32.xlu2 %v492_v6  ;;  %407 = vmax.xlane.f32.xlu1 %v404_v7 }
  0x7c   : > { %347 = vmax.xlane.f32.xlu0 %v344_v8 }
  0x83   : > { %417 = vmax.xlane.f32.xlu2 %v415_v12  ;;  %359 = vmax.xlane.f32.xlu1 %v356_v13 }
  0x84   : > { %357 = vmax.xlane.f32.xlu0 %v355_v14 }
  0x8b   : > { %505 = vmax.xlane.f32.xlu1 %v503_v16  ;;  %507 = vmax.xlane.f32.xlu2 %v504_v17 }
  0x8c   : > { %419 = vmax.xlane.f32.xlu0 %v416_v18 }
  0xe6   : > { %v494_v37 = vpop.xlane.xlu2 %493  ;;  %v406_v38 = vpop.xlane.xlu1 %405 }
  0xe7   : > { %v497_v39 = vpack.c.bf16 %v494_v37, %v494_v37  ;;  %v409_v40 = vpack.c.bf16 %v406_v38, %v406_v38  ;;  %v346_v41 = vpop.xlane.xlu0 %345 }
  0xe8   : > { %v349_v42 = vpack.c.bf16 %v346_v41, %v346_v41 }
  0xe9   : > { %v499_v43 = vunpack.c.l.bf16 %v497_v39  ;;  %v411_v44 = vunpack.c.l.bf16 %v409_v40 }
  0xea   : > { %v351_v45 = vunpack.c.l.bf16 %v349_v42 }
  0xeb   : > { %v413_v46 = vmul.f32 0.5, %v411_v44  ;;  %v501_v48 = vmul.f32 0.5, %v499_v43 }
  0xec   : > { %v1205_v47 = vmul.f32 0.5, %v351_v45 }
  0xee   : > { %v371_v49 = vsub.f32 %v1171_v20, %v1205_v47  ;;  %v1210_v50 = vmax.f32 %v1205_v47, %v413_v46  ;;  %v496_v51 = vpop.xlane.xlu2 %495  ;;  %v408_v52 = vpop.xlane.xlu1 %407 }
  0xef   : > { %v498_v53 = vpack.c.bf16 %v496_v51, %v496_v51  ;;  %v410_v54 = vpack.c.bf16 %v408_v52, %v408_v52  ;;  %v348_v55 = vpop.xlane.xlu0 %347 }
  0xf0   : > { %v373_v56 = vmul.f32 1.442695, %v371_v49  ;;  %v433_v57 = vsub.f32 %v1205_v47, %v1210_v50  ;;  %v350_v58 = vpack.c.bf16 %v348_v55, %v348_v55  ;;  %v439_v59 = vsub.f32 %v1175_v22, %v1210_v50 }
  0xf1   : > { %v500_v60 = vunpack.c.l.bf16 %v498_v53  ;;  %v412_v61 = vunpack.c.l.bf16 %v410_v54  ;;  %v1217_v62 = vmax.f32 %v1210_v50, %v501_v48 }
  0xf2   : > { %v352_v63 = vunpack.c.l.bf16 %v350_v58  ;;  %825 = vpow2.f32 %v373_v56  ;;  %v441_v0 = vmul.f32 1.442695, %v439_v59 }
  0xf3   : > { %v414_v1 = vmul.f32 0.5, %v412_v61  ;;  %v527_v2 = vsub.f32 %v1181_v25, %v1217_v62  ;;  %v521_v3 = vsub.f32 %v1210_v50, %v1217_v62  ;;  %v502_v5 = vmul.f32 0.5, %v500_v60 }
  0xf4   : > { %v1223_v4 = vmul.f32 0.5, %v352_v63  ;;  %827 = vpow2.f32 %v441_v0 }
  0xf5   : > { %v529_v6 = vmul.f32 1.442695, %v527_v2 }
  0xf6   : > { %v372_v7 = vsub.f32 %v1189_v29, %v1223_v4  ;;  %v1228_v8 = vmax.f32 %v1223_v4, %v414_v1  ;;  %v418_v9 = vpop.xlane.xlu2 %417  ;;  %v360_v10 = vpop.xlane.xlu1 %359 }
  0xf7   : > { %v421_v11 = vpack.c.bf16 %v418_v9, %v418_v9  ;;  %v362_v12 = vpack.c.bf16 %v360_v10, %v360_v10  ;;  %v358_v13 = vpop.xlane.xlu0 %357  ;;  %829 = vpow2.f32 %v529_v6 }
  0xf8   : > { %v826_v14 = vpop.eup %825  ;;  %v375_v15 = vmul.f32 1.442695, %v372_v7  ;;  %v434_v16 = vsub.f32 %v1223_v4, %v1228_v8  ;;  %v361_v17 = vpack.c.bf16 %v358_v13, %v358_v13  ;;  %v440_v18 = vsub.f32 %v1193_v31, %v1228_v8 }
  0xf9   : > { %v423_v37 = vunpack.c.l.bf16 %v421_v11  ;;  %v364_v38 = vunpack.c.l.bf16 %v362_v12  ;;  %377 = vadd.xlane.f32.xlu0 %v826_v14  ;;  %v1237_v39 = vmul.f32 %v826_v14, %v381_v24  ;;  %v1240_v40 = vmax.f32 %v1228_v8, %v502_v5 }
  0xfa   : > { %v363_v41 = vunpack.c.l.bf16 %v361_v17  ;;  %831 = vpow2.f32 %v375_v15  ;;  %v443_v42 = vmul.f32 1.442695, %v440_v18  ;;  %v828_v43 = vpop.eup %827 }
  0xfb   : > { %v425_v44 = vmul.f32 0.5, %v423_v37  ;;  %v1242_v45 = vmul.f32 0.5, %v364_v38  ;;  %v528_v46 = vsub.f32 %v1199_v34, %v1240_v40  ;;  %447 = vadd.xlane.f32.xlu2 %v828_v43  ;;  %v1251_v20 = vmul.f32 %v828_v43, %v455_v26 }
  0xfc   : > { %v1246_v48 = vmul.f32 0.5, %v363_v41  ;;  %v522_v24 = vsub.f32 %v1228_v8, %v1240_v40  ;;  %833 = vpow2.f32 %v443_v42 }
  0xfd   : > { %v830_v49 = vpop.eup %829  ;;  %v390_v51 = vsub.f32 %v1185_v27, %v1242_v45  ;;  %v531_v52 = vmul.f32 1.442695, %v528_v46 }
  0xfe   : > { %v389_v53 = vsub.f32 %v1169_v19, %v1246_v48  ;;  %v1260_v54 = vmax.f32 %v1246_v48, %v425_v44  ;;  %v506_v55 = vpop.xlane.xlu1 %505  ;;  %v508_v56 = vpop.xlane.xlu2 %507  ;;  %v545_v22 = vmul.f32 %v830_v49, %v543_v28 }
  0xff   : > { %v393_v26 = vmul.f32 1.442695, %v390_v51  ;;  %v509_v58 = vpack.c.bf16 %v506_v55, %v506_v55  ;;  %v420_v59 = vpop.xlane.xlu0 %419  ;;  %v510_v60 = vpack.c.bf16 %v508_v56, %v508_v56  ;;  %835 = vpow2.f32 %v531_v52 }
 0x100   : > { %v832_v61 = vpop.eup %831  ;;  %v391_v63 = vmul.f32 1.442695, %v389_v53  ;;  %v467_v0 = vsub.f32 %v1246_v48, %v1260_v54  ;;  %v422_v19 = vpack.c.bf16 %v420_v59, %v420_v59  ;;  %v475_v1 = vsub.f32 %v1173_v21, %v1260_v54 }
 0x101   : > { %v511_v2 = vunpack.c.l.bf16 %v509_v58  ;;  %v512_v5 = vunpack.c.l.bf16 %v510_v60  ;;  %379 = vadd.xlane.f32.xlu1 %v832_v61  ;;  %837 = vpow2.f32 %v393_v26  ;;  %v384_v25 = vmul.f32 %v832_v61, %v382_v33 }
 0x102   : > { %v424_v28 = vunpack.c.l.bf16 %v422_v19  ;;  %839 = vpow2.f32 %v391_v63  ;;  %v477_v6 = vmul.f32 1.442695, %v475_v1  ;;  %v834_v7 = vpop.eup %833  ;;  %v469_v47 = vmul.f32 1.442695, %v467_v0 }
 0x103   : > { %v513_v9 = vmul.f32 0.5, %v511_v2  ;;  %v514_v11 = vmul.f32 0.5, %v512_v5  ;;  %v458_v12 = vmul.f32 %v834_v7, %v456_v35  ;;  %v525_v48 = vmul.f32 1.442695, %v522_v24 }
 0x104   : > { %v426_v10 = vmul.f32 0.5, %v424_v28  ;;  %841 = vpow2.f32 %v477_v6  ;;  %v604_v59 = vlaneseq  ;;  %v607_v1 = vstv %s779_s25 }
 0x105   : > { %v836_v21 = vpop.eup %835  ;;  %v1276_v13 = vmax.f32 %v1260_v54, %v513_v9 }
 0x106   : > { %v1279_v14 = vmax.f32 %v1242_v45, %v426_v10  ;;  %v546_v27 = vmul.f32 %v836_v21, %v544_v36  ;;  %v605_v0 = vshrl.u32 %v604_v59, 7  ;;  %v601_v10 = vld [vmem:[%s327_s6] sm:$0xff] }
 0x107   : > { %v838_v29 = vpop.eup %837  ;;  %v555_v33 = vsub.f32 %v1260_v54, %v1276_v13  ;;  %v585_v31 = vsub.f32 %v1276_v13, %v1217_v62  ;;  %v563_v41 = vsub.f32 %v1177_v23, %v1276_v13  ;;  %v435_v23 = vmul.f32 1.442695, %v433_v57 }
 0x108   : > { %v840_v35 = vpop.eup %839  ;;  %v1289_v15 = vmax.f32 %v1279_v14, %v514_v11  ;;  %v468_v17 = vsub.f32 %v1242_v45, %v1279_v14  ;;  %v476_v36 = vsub.f32 %v1191_v30, %v1279_v14  ;;  %v1333_v28 = vadd.s32 %v607_v1, %v605_v0 }
 0x109   : > { %397 = vadd.xlane.f32.xlu1 %v838_v29  ;;  %395 = vadd.xlane.f32.xlu0 %v840_v35  ;;  %v565_v43 = vmul.f32 1.442695, %v563_v41  ;;  %v557_v50 = vmul.f32 1.442695, %v555_v33  ;;  %v606_v11 = vadd.s32 8, %v605_v0 }
 0x10a   : > { %v556_v34 = vsub.f32 %v1279_v14, %v1289_v15  ;;  %v842_v18 = vpop.eup %841  ;;  %v586_v37 = vsub.f32 %v1289_v15, %v1240_v40  ;;  %v479_v38 = vmul.f32 1.442695, %v476_v36  ;;  %v564_v42 = vsub.f32 %v1195_v32, %v1289_v15 }
 0x10b   : > { %481 = vadd.xlane.f32.xlu2 %v842_v18  ;;  %v523_v32 = vmul.f32 1.442695, %v521_v3  ;;  %v437_v3 = vmul.f32 1.442695, %v434_v16  ;;  %v471_v60 = vmul.f32 1.442695, %v468_v17  ;;  %v1340_v29 = vadd.s32 %v607_v1, %v606_v11 }
 0x10c   : > { %843 = vpow2.f32 %v479_v38  ;;  %v567_v44 = vmul.f32 1.442695, %v564_v42  ;;  %v559_v8 = vmul.f32 1.442695, %v556_v34  ;;  %vm610_vm0 = vcmp.lt.s32.totalorder %v1333_v28, 18 }
 0x10d   : > { %845 = vpow2.f32 %v565_v43  ;;  %v1344_v17 = vsel %vm610_vm0, %v601_v10, 0.0  ;;  %vm611_vm2 = vcmp.lt.s32.totalorder %v1340_v29, 18 }
 0x10e   : > { %847 = vpow2.f32 %v567_v44  ;;  %v630_v36 = vsel %vm618_vm1, %v1344_v17, 0.0 }
 0x10f   : > { %849 = vpow2.f32 %v435_v23 }
 0x110   : > { %851 = vpow2.f32 %v523_v32 }
 0x111   : > { %449 = vadd.xlane.f32.xlu0 %v834_v7  ;;  %385 = vadd.xlane.f32.xlu1 %v1237_v39  ;;  %853 = vpow2.f32 %v469_v47 }
 0x112   : > { %v844_v30 = vpop.eup %843  ;;  %855 = vpow2.f32 %v557_v50 }
 0x113   : > { %387 = vadd.xlane.f32.xlu2 %v384_v25  ;;  %v846_v45 = vpop.eup %845  ;;  %857 = vpow2.f32 %v437_v3 }
 0x114   : > { %v848_v46 = vpop.eup %847  ;;  %859 = vpow2.f32 %v525_v48 }
 0x115   : > { %v1311_v39 = vpop.eup %849  ;;  %861 = vpow2.f32 %v471_v60 }
 0x116   : > { %v1314_v53 = vpop.eup %851  ;;  %863 = vpow2.f32 %v559_v8 }
 0x117   : > { %v854_v56 = vpop.eup %853 }
 0x118   : > { %v856_v4 = vpop.eup %855 }
 0x119   : > { %483 = vadd.xlane.f32.xlu0 %v844_v30  ;;  %535 = vadd.xlane.f32.xlu1 %v830_v49  ;;  %v858_v16 = vpop.eup %857 }
 0x11a   : > { %v1331_v25 = vpop.eup %859 }
 0x11b   : > { %537 = vadd.xlane.f32.xlu2 %v836_v21  ;;  %v862_v9 = vpop.eup %861 }
 0x11c   : > { %v864_v34 = vpop.eup %863 }
 0x121   : > { %569 = vadd.xlane.f32.xlu0 %v846_v45  ;;  %571 = vadd.xlane.f32.xlu1 %v848_v46 }
 0x123   : > { %459 = vadd.xlane.f32.xlu2 %v1251_v20 }
 0x129   : > { %461 = vadd.xlane.f32.xlu0 %v458_v12  ;;  %547 = vadd.xlane.f32.xlu1 %v545_v22 }
 0x12b   : > { %549 = vadd.xlane.f32.xlu2 %v546_v27  ;;  %v602_v27 = vld [vmem:[%s327_s6 + $0x8] sm:$0xff] }
 0x12c   : > { %v1351_v41 = vsel %vm611_vm2, %v602_v27, 0.0 }
 0x12d   : > { %v631_v43 = vsel %vm618_vm1, %v1351_v41, 0.0 }
 0x12e   : > { %v632_v44 = vadd.f32 %v631_v43, %v630_v36 }
 0x130   : > { %v633_v30 = vrot.slane %v632_v44, 4 }
 0x16c   : > { %v378_v49 = vpop.xlane.xlu0 %377 }
 0x16d   : > { %v445_v51 = vmul.f32 %v1311_v39, %v378_v49  ;;  %v634_v49 = vadd.f32 %v633_v30, %v632_v44 }
 0x16e   : > { %v448_v20 = vpop.xlane.xlu2 %447 }
 0x16f   : > { %v451_v52 = vadd.f32 %v448_v20, %v445_v51  ;;  %v635_v47 = vrot.slane %v634_v49, 2 }
 0x171   : > { %v533_v57 = vmul.f32 %v1314_v53, %v451_v52 }
 0x174   : > { %v380_v55 = vpop.xlane.xlu1 %379 }
 0x175   : > { %v446_v19 = vmul.f32 %v858_v16, %v380_v55 }
 0x17c   : > { %v398_v22 = vpop.xlane.xlu1 %397  ;;  %v396_v26 = vpop.xlane.xlu0 %395 }
 0x17d   : > { %v473_v54 = vmul.f32 %v854_v56, %v396_v26  ;;  %v474_v12 = vmul.f32 %v862_v9, %v398_v22  ;;  %v636_v22 = vadd.f32 %v635_v47, %v634_v49 }
 0x17e   : > { %v482_v58 = vpop.xlane.xlu2 %481 }
 0x17f   : > { %v485_v61 = vadd.f32 %v482_v58, %v473_v54  ;;  %v637_v54 = vrot.slane %v636_v22, 1 }
 0x181   : > { %v561_v63 = vmul.f32 %v856_v4, %v485_v61 }
 0x184   : > { %v450_v24 = vpop.xlane.xlu0 %449  ;;  %v386_v2 = vpop.xlane.xlu1 %385 }
 0x185   : > { %v452_v5 = vadd.f32 %v450_v24, %v446_v19  ;;  %v453_v51 = vmul.f32 %v1311_v39, %v386_v2 }
 0x186   : > { %v388_v6 = vpop.xlane.xlu2 %387 }
 0x187   : > { %v534_v7 = vmul.f32 %v1331_v25, %v452_v5  ;;  %v454_v48 = vmul.f32 %v858_v16, %v388_v6 }
 0x18c   : > { %v484_v21 = vpop.xlane.xlu0 %483  ;;  %v536_v14 = vpop.xlane.xlu1 %535 }
 0x18d   : > { %v486_v33 = vadd.f32 %v484_v21, %v474_v12  ;;  %v539_v35 = vadd.f32 %v536_v14, %v533_v57 }
 0x18e   : > { %v538_v18 = vpop.xlane.xlu2 %537 }
 0x18f   : > { %865 = vrcp.f32 %v539_v35  ;;  %v562_v38 = vmul.f32 %v864_v34, %v486_v33  ;;  %v540_v42 = vadd.f32 %v538_v18, %v534_v7 }
 0x191   : > { %867 = vrcp.f32 %v540_v42 }
 0x194   : > { %v570_v45 = vpop.xlane.xlu0 %569  ;;  %v572_v46 = vpop.xlane.xlu1 %571 }
 0x195   : > { %v866_v23 = vpop.eup %865  ;;  %v573_v32 = vadd.f32 %v570_v45, %v561_v63  ;;  %v574_v50 = vadd.f32 %v572_v46, %v562_v38  ;;  %v638_v63 = vadd.f32 %v637_v54, %v636_v22 }
 0x196   : > { %v577_v20 = vmul.f32 %v866_v23, %v539_v35  ;;  %v460_v52 = vpop.xlane.xlu2 %459 }
 0x197   : > { %v868_v57 = vpop.eup %867  ;;  %869 = vlog2.f32 %v573_v32  ;;  %v463_v3 = vadd.f32 %v460_v52, %v453_v51  ;;  %639 = vst.msk [vmem:[%s338_s9] sm:$0x1] %vm628_vm3, %v638_v63 }
 0x198   : > { %v579_v55 = vsub.f32 2.0, %v577_v20  ;;  %v578_v56 = vmul.f32 %v868_v57, %v540_v42  ;;  %871 = vlog2.f32 %v539_v35 }
 0x199   : > { %v541_v26 = vmul.f32 %v1314_v53, %v463_v3  ;;  %873 = vlog2.f32 %v574_v50 }
 0x19a   : > { %v581_v58 = vmul.f32 %v866_v23, %v579_v55  ;;  %v580_v60 = vsub.f32 2.0, %v578_v56  ;;  %875 = vlog2.f32 %v540_v42 }
 0x19c   : > { %v462_v39 = vpop.xlane.xlu0 %461  ;;  %v548_v59 = vpop.xlane.xlu1 %547  ;;  %v582_v5 = vmul.f32 %v868_v57, %v580_v60 }
 0x19d   : > { %v464_v61 = vadd.f32 %v462_v39, %v454_v48  ;;  %v551_v4 = vadd.f32 %v548_v59, %v541_v26  ;;  %v870_v0 = vpop.eup %869 }
 0x19e   : > { %v872_v16 = vpop.eup %871  ;;  %v550_v1 = vpop.xlane.xlu2 %549  ;;  %v590_v8 = vmul.f32 0.6931472, %v870_v0 }
 0x19f   : > { %v583_v19 = vmul.f32 %v581_v58, %v551_v4  ;;  %v542_v53 = vmul.f32 %v1331_v25, %v464_v61  ;;  %v874_v6 = vpop.eup %873  ;;  %v596_v7 = vmul.f32 0.6931472, %v872_v16 }
 0x1a0   : > { %v876_v11 = vpop.eup %875  ;;  %v592_v12 = vmul.f32 0.6931472, %v874_v6 }
 0x1a1   : > { %v587_v24 = vadd.f32 %v585_v31, %v583_v19  ;;  %v552_v2 = vadd.f32 %v550_v1, %v542_v53  ;;  %v598_v14 = vmul.f32 0.6931472, %v876_v11 }
 0x1a3   : > { %v593_v9 = vadd.f32 %v590_v8, %v587_v24  ;;  %v584_v10 = vmul.f32 %v582_v5, %v552_v2 }
 0x1a5   : > { %v599_v21 = vsub.f32 %v593_v9, %v596_v7  ;;  %v588_v25 = vadd.f32 %v586_v37, %v584_v10 }
 0x1a7   : > { %v614_v27 = vsel %vm610_vm0, %v599_v21, 0.0  ;;  %v594_v62 = vadd.f32 %v592_v12, %v588_v25 }
 0x1a8   : > { %v616_v31 = vmul.f32 %v614_v27, %v1344_v17 }
 0x1a9   : > { %v600_v13 = vsub.f32 %v594_v62, %v598_v14 }
 0x1aa   : > { %v619_v34 = vsel %vm618_vm1, %v616_v31, 0.0 }
 0x1ab   : > { %v615_v33 = vsel %vm611_vm2, %v600_v13, 0.0 }
 0x1ac   : > { %v617_v35 = vmul.f32 %v615_v33, %v1351_v41 }
 0x1ae   : > { %v620_v36 = vsel %vm618_vm1, %v617_v35, 0.0 }
 0x1af   : > { %v621_v40 = vadd.f32 %v620_v36, %v619_v34 }
 0x1b1   : > { %v622_v15 = vrot.slane %v621_v40, 4 }
 0x1b3   : > { %v623_v37 = vadd.f32 %v622_v15, %v621_v40 }
 0x1b5   : > { %v624_v18 = vrot.slane %v623_v37, 2 }
 0x1b7   : > { %v625_v38 = vadd.f32 %v624_v18, %v623_v37 }
 0x1b9   : > { %v626_v28 = vrot.slane %v625_v38, 1 }
 0x1bb   : > { %v627_v17 = vadd.f32 %v626_v28, %v625_v38 }
 0x1bd   : > { %629 = vst.msk [vmem:[%s335_s14] sm:$0x1] %vm628_vm3, %v627_v17 }
 0x1be PF: > { %p18_p2 = scmp.ge.s32.totalorder %s1048_s20, 4   ;;  %s1408_s15 = smov %s985_s16 }
 0x1bf   : > { %s1409_s16 = smov %s989_s17  ;;  %s1410_s17 = smov %s1058_s23 }
 0x1c0   : > { %s1411_s18 = smov %s1048_s20  ;;  %20 = sbr.rel (!%p18_p2) target bundleno = 5 (0x5), region = 100 }
 0x1c5   :  { %669 = vsyncpa [#allocation3], 1 }
 0x1c6   :  { %671 = vsyncpa [#allocation3 + $0x1], 1 }
 0x1c7   :  { %672 = vsyncpa [#allocation5], 1 }
 0x1c8   :  { %674 = vsyncpa [#allocation5 + $0x1], 1 }

</bundles_post_ra>
